<compile_context>
chip_gen: v7x
topology: tpu7x:2x2x1
jax: 0.10.0
libtpu: 0.0.40
codegen_flags: <defaults>
</compile_context>

<pallas_src>
import functools

import jax
import jax.numpy as jnp
from jax.experimental import pallas as pl
from jax.experimental.pallas import tpu as pltpu


def _round_up(x, m):
    return (x + m - 1) // m * m


# --------------------------------------------------------------------------
# Pallas tiled matmul (conv hot path via im2col), bf16 inputs, f32 accumulator
# --------------------------------------------------------------------------
def _matmul_kernel(a_ref, b_ref, o_ref, acc_ref):
    @pl.when(pl.program_id(2) == 0)
    def _():
        acc_ref[...] = jnp.zeros_like(acc_ref)

    acc_ref[...] += jnp.dot(a_ref[...], b_ref[...],
                            preferred_element_type=jnp.float32)

    @pl.when(pl.program_id(2) == pl.num_programs(2) - 1)
    def _():
        o_ref[...] = acc_ref[...].astype(o_ref.dtype)


def _pick_tiles(M, K, N):
    # tm: multiple of 16 (bf16 sublane packing) and never more than needed.
    tm = min(128, _round_up(M, 16))
    # 256-wide K/N tiles only when they divide exactly (MXU-shaped on v6e/v7x,
    # zero extra padding); otherwise 128 (also matches the v5e MXU).
    tk = 256 if K % 256 == 0 else 128
    tn = 256 if N % 256 == 0 else 128
    return tm, tk, tn


def pallas_matmul(a_bf16, b_bf16):
    """a: (M, K) bf16, b: (K, N) bf16 -> (M, N) f32."""
    M, K = a_bf16.shape
    K2, N = b_bf16.shape
    assert K == K2
    tm, tk, tn = _pick_tiles(M, K, N)
    Mp, Kp, Np = _round_up(M, tm), _round_up(K, tk), _round_up(N, tn)
    a_p = a_bf16 if (Mp == M and Kp == K) else jnp.pad(
        a_bf16, ((0, Mp - M), (0, Kp - K)))
    b_p = b_bf16 if (Kp == K and Np == N) else jnp.pad(
        b_bf16, ((0, Kp - K), (0, Np - N)))

    cost = pl.CostEstimate(flops=2 * M * N * K, transcendentals=0,
                           bytes_accessed=(M * K + K * N) * 2 + M * N * 4)

    out = pl.pallas_call(
        _matmul_kernel,
        out_shape=jax.ShapeDtypeStruct((Mp, Np), jnp.float32),
        grid_spec=pltpu.PrefetchScalarGridSpec(
            num_scalar_prefetch=0,
            grid=(Mp // tm, Np // tn, Kp // tk),
            in_specs=[pl.BlockSpec((tm, tk), lambda i, j, k: (i, k)),
                      pl.BlockSpec((tk, tn), lambda i, j, k: (k, j))],
            out_specs=pl.BlockSpec((tm, tn), lambda i, j, k: (i, j)),
            scratch_shapes=[pltpu.VMEM((tm, tn), jnp.float32)]),
        compiler_params=pltpu.CompilerParams(
            dimension_semantics=("parallel", "parallel", "arbitrary")),
        cost_estimate=cost,
    )(a_p, b_p)
    if Mp != M or Np != N:
        out = out[:M, :N]
    return out


# --------------------------------------------------------------------------
# Standardized convolution (StdConv2d): weight standardization done ONCE in
# prepare_params; per-call work is im2col (bf16) + Pallas MXU matmul.
# --------------------------------------------------------------------------
def prepare_conv(w_oihw):
    O, I, kh, kw = w_oihw.shape
    m = jnp.mean(w_oihw, axis=(1, 2, 3), keepdims=True)
    v = jnp.mean((w_oihw - m) ** 2, axis=(1, 2, 3), keepdims=True)  # biased var
    w = (w_oihw - m) / jnp.sqrt(v + 1e-5)
    w2 = jnp.transpose(w, (2, 3, 1, 0)).reshape(kh * kw * I, O)  # (K, Cout)
    return {"w2": w2.astype(jnp.bfloat16), "kh": kh, "kw": kw, "cout": O}


def std_conv(x, wp, stride, pad):
    # x: (B, H, W, Cin) f32   wp: prepared weight dict
    kh, kw, O = wp["kh"], wp["kw"], wp["cout"]
    B, H, W, C = x.shape
    xb = x.astype(jnp.bfloat16)  # bf16 im2col -> half the HBM bytes for the LHS
    if pad:
        xb = jnp.pad(xb, ((0, 0), (pad, pad), (pad, pad), (0, 0)))
    Hp, Wp_ = H + 2 * pad, W + 2 * pad
    Ho = (Hp - kh) // stride + 1
    Wo = (Wp_ - kw) // stride + 1
    if kh == 1 and kw == 1 and stride == 1:
        cols = xb.reshape(B * H * W, C)                 # no im2col gather needed
    else:
        cols = []
        for di in range(kh):
            for dj in range(kw):
                cols.append(xb[:, di:di + stride * (Ho - 1) + 1:stride,
                               dj:dj + stride * (Wo - 1) + 1:stride, :])
        cols = jnp.concatenate(cols, axis=-1).reshape(B * Ho * Wo, kh * kw * C)
    y = pallas_matmul(cols, wp["w2"])                   # (B*Ho*Wo, Cout) f32
    return y.reshape(B, Ho, Wo, O)


# --------------------------------------------------------------------------
# GroupNorm Pallas kernel (per-batch block), centered two-pass statistics,
# optional fused residual add + ReLU (replaces the standalone add_relu kernel).
# --------------------------------------------------------------------------
def _gn_kernel(x_ref, g_ref, b_ref, m_ref, mt_ref, *rest,
               count, eps, relu, has_residual):
    if has_residual:
        r_ref, o_ref = rest
    else:
        (o_ref,) = rest
    x = x_ref[0]                                              # (HW, C) f32
    # pass 1: group means
    s = jnp.sum(x, axis=0, keepdims=True)                     # (1, C)
    gs = jnp.dot(s, m_ref[...], preferred_element_type=jnp.float32)        # (1, G)
    mean_c = jnp.dot(gs / count, mt_ref[...],
                     preferred_element_type=jnp.float32)                   # (1, C)
    # pass 2: centered variance (no E[x^2]-E[x]^2 cancellation)
    d = x - mean_c
    sq = jnp.sum(d * d, axis=0, keepdims=True)                # (1, C)
    gv = jnp.dot(sq, m_ref[...], preferred_element_type=jnp.float32) / count  # (1, G)
    var_c = jnp.dot(gv, mt_ref[...], preferred_element_type=jnp.float32)      # (1, C)
    inv = jax.lax.rsqrt(var_c + eps)
    y = d * inv * g_ref[...] + b_ref[...]
    if has_residual:
        y = y + r_ref[0]
    if relu:
        y = jnp.maximum(y, 0.0)
    o_ref[0] = y


def group_norm(x, gamma, beta, num_groups, eps, relu=False, residual=None):
    B, H, W, C = x.shape
    G = num_groups
    assert C % G == 0
    x3 = x.reshape(B, H * W, C)
    gidx = jnp.arange(C) // (C // G)
    onehot = (gidx[:, None] == jnp.arange(G)[None, :]).astype(jnp.float32)  # (C, G)
    onehot_t = onehot.T                                                     # (G, C)
    kern = functools.partial(_gn_kernel, count=float(H * W * (C // G)),
                             eps=float(eps), relu=relu,
                             has_residual=residual is not None)
    in_specs = [pl.BlockSpec((1, H * W, C), lambda b: (b, 0, 0)),
                pl.BlockSpec((1, C), lambda b: (0, 0)),
                pl.BlockSpec((1, C), lambda b: (0, 0)),
                pl.BlockSpec((C, G), lambda b: (0, 0)),
                pl.BlockSpec((G, C), lambda b: (0, 0))]
    args = [x3, gamma.reshape(1, C), beta.reshape(1, C), onehot, onehot_t]
    if residual is not None:
        in_specs.append(pl.BlockSpec((1, H * W, C), lambda b: (b, 0, 0)))
        args.append(residual.reshape(B, H * W, C))
    out = pl.pallas_call(
        kern,
        out_shape=jax.ShapeDtypeStruct((B, H * W, C), jnp.float32),
        grid=(B,),
        in_specs=in_specs,
        out_specs=pl.BlockSpec((1, H * W, C), lambda b: (b, 0, 0)),
        compiler_params=pltpu.CompilerParams(
            dimension_semantics=("parallel",)),
    )(*args)
    return out.reshape(B, H, W, C)


# --------------------------------------------------------------------------
# MaxPool 3x3 / stride 2 / pad 0: jnp.maximum reduction tree over strided
# slices; XLA fuses this into a single pass (no 9x HBM materialization,
# per perf review).
# --------------------------------------------------------------------------
def max_pool_3x3_s2(x):
    B, H, W, C = x.shape
    Ho = (H - 3) // 2 + 1
    Wo = (W - 3) // 2 + 1
    out = None
    for di in range(3):
        for dj in range(3):
            sl = x[:, di:di + 2 * (Ho - 1) + 1:2,
                   dj:dj + 2 * (Wo - 1) + 1:2, :]
            out = sl if out is None else jnp.maximum(out, sl)
    return out


# --------------------------------------------------------------------------
# Deterministic parameter initialization (shapes match the PyTorch module)
# --------------------------------------------------------------------------
def init_conv(key, cout, cin, k):
    return jax.random.normal(key, (cout, cin, k, k), jnp.float32) * 0.05


def init_gn(key, c):
    k1, k2 = jax.random.split(key)
    gamma = 1.0 + 0.1 * jax.random.normal(k1, (c,), jnp.float32)
    beta = 0.1 * jax.random.normal(k2, (c,), jnp.float32)
    return gamma, beta


def init_bottleneck(key, cin, cout, cmid, stride):
    ks = jax.random.split(key, 8)
    p = {
        "conv1": init_conv(ks[0], cmid, cin, 1),
        "conv2": init_conv(ks[1], cmid, cmid, 3),
        "conv3": init_conv(ks[2], cout, cmid, 1),
        "gn1": init_gn(ks[3], cmid),
        "gn2": init_gn(ks[4], cmid),
        "gn3": init_gn(ks[5], cout),
        "stride": stride,
    }
    if stride != 1 or cin != cout:
        p["downsample"] = init_conv(ks[6], cout, cin, 1)
        p["gn_proj"] = init_gn(ks[7], cout)
    return p


def init_resnetv2(key, input_channels=3, width_factor=0.5, num_layers=(1, 1, 1)):
    width = int(64 * width_factor)
    n_units = sum(num_layers)
    keys = jax.random.split(key, 2 + n_units)
    params = {
        "root_conv": init_conv(keys[0], width, input_channels, 7),
        "root_gn": init_gn(keys[1], width),
    }
    specs = [
        (width,       width * 4,  width,     1),
        (width * 4,   width * 8,  width * 2, 2),
        (width * 8,   width * 16, width * 4, 2),
    ]
    blocks = []
    ki = 2
    for bi, (cin0, cout, cmid, stride0) in enumerate(specs):
        units = []
        for u in range(num_layers[bi]):
            cin = cin0 if u == 0 else cout
            stride = stride0 if u == 0 else 1
            units.append(init_bottleneck(keys[ki], cin, cout, cmid, stride))
            ki += 1
        blocks.append(units)
    params["blocks"] = blocks
    return params


def prepare_params(params):
    """One-time hot-path prep: weight standardization + HWIO reshape + bf16 cast."""
    def prep_unit(u):
        q = dict(u)
        for name in ("conv1", "conv2", "conv3", "downsample"):
            if name in q:
                q[name] = prepare_conv(q[name])
        return q
    return {
        "root_conv": prepare_conv(params["root_conv"]),
        "root_gn": params["root_gn"],
        "blocks": [[prep_unit(u) for u in blk] for blk in params["blocks"]],
    }


# --------------------------------------------------------------------------
# Forward passes
# --------------------------------------------------------------------------
def bottleneck_forward(p, x):
    if "downsample" in p:
        residual = std_conv(x, p["downsample"], stride=p["stride"], pad=0)
        residual = group_norm(residual, *p["gn_proj"],
                              num_groups=residual.shape[-1], eps=1e-5, relu=False)
    else:
        residual = x
    y = std_conv(x, p["conv1"], stride=1, pad=0)
    y = group_norm(y, *p["gn1"], num_groups=32, eps=1e-6, relu=True)
    y = std_conv(y, p["conv2"], stride=p["stride"], pad=1)
    y = group_norm(y, *p["gn2"], num_groups=32, eps=1e-6, relu=True)
    y = std_conv(y, p["conv3"], stride=1, pad=0)
    # fused: relu(residual + gn3(y)) in one Pallas kernel
    return group_norm(y, *p["gn3"], num_groups=32, eps=1e-6, relu=True,
                      residual=residual)


def resnetv2_forward(params, x_nchw):
    x = jnp.transpose(x_nchw, (0, 2, 3, 1))  # NCHW -> NHWC (internal layout)
    features = [x]
    # root: StdConv 7x7 s2 p3 -> GroupNorm(32) -> ReLU
    x = std_conv(x, params["root_conv"], stride=2, pad=3)
    x = group_norm(x, *params["root_gn"], num_groups=32, eps=1e-6, relu=True)
    features.append(x)
    x = max_pool_3x3_s2(x)
    blocks = params["blocks"]
    for block in blocks[:-1]:
        for unit in block:
            x = bottleneck_forward(unit, x)
        features.append(x)
    for unit in blocks[-1]:
        x = bottleneck_forward(unit, x)
    to_nchw = lambda t: jnp.transpose(t, (0, 3, 1, 2))
    return to_nchw(x), [to_nchw(f) for f in features[::-1]]


if __name__ == "__main__":
    key = jax.random.PRNGKey(0)
    pkey, xkey = jax.random.split(key)
    # small config: width_factor=0.5 -> width=32, one unit per block, 32x32 images
    params = init_resnetv2(pkey, input_channels=3, width_factor=0.5,
                           num_layers=(1, 1, 1))
    prepared = prepare_params(params)
    x = jax.random.normal(xkey, (2, 3, 32, 32), jnp.float32)  # NCHW, like PyTorch

    out, feats = resnetv2_forward(prepared, x)
    jax.block_until_ready((out, feats))

    # sanity on shapes implied by the module (B, 16*width, H/16, W/16) etc.
    assert out.shape == (2, 512, 2, 2)
    assert feats[0].shape == (2, 256, 4, 4)
    assert feats[1].shape == (2, 128, 7, 7)
    assert feats[2].shape == (2, 32, 16, 16)
    assert feats[3].shape == (2, 3, 32, 32)
    print("KERNEL_OK")
</pallas_src>

<mosaic_0001>
module attributes {stable_mosaic.version = 11 : i64} {
  func.func @_matmul_kernel(%arg0: i32, %arg1: i32, %arg2: i32, %arg3: memref<128x128xbf16, #tpu.memory_space<vmem>>, %arg4: memref<128x128xbf16, #tpu.memory_space<vmem>>, %arg5: memref<128x128xf32, #tpu.memory_space<vmem>>, %arg6: memref<128x128xf32, #tpu.memory_space<vmem>>) attributes {dimension_semantics = [#tpu.dimension_semantics<parallel>, #tpu.dimension_semantics<parallel>, #tpu.dimension_semantics<arbitrary>], iteration_bounds = array<i64: 4, 1, 2>, scalar_prefetch = 0 : i64, scratch_operands = 1 : i64, tpu.core_type = #tpu.core_type<tc>, window_params = [{transform_indices = @transform_0, window_bounds = array<i64: 128, 128>}, {transform_indices = @transform_1, window_bounds = array<i64: 128, 128>}, {transform_indices = @transform_2, window_bounds = array<i64: 128, 128>}]} {
    %c0_i32 = arith.constant 0 : i32
    %0 = arith.cmpi eq, %arg2, %c0_i32 : i32
    %1 = arith.extui %0 : i1 to i32
    %c0_i32_0 = arith.constant 0 : i32
    %2 = arith.cmpi ne, %1, %c0_i32_0 : i32
    scf.if %2 {
      %cst_9 = arith.constant 0.000000e+00 : f32
      %12 = vector.broadcast %cst_9 : f32 to vector<128x128xf32>
      %c0_10 = arith.constant 0 : index
      %c0_11 = arith.constant 0 : index
      %13 = vector.load %arg6[%c0_10, %c0_11] : memref<128x128xf32, #tpu.memory_space<vmem>>, vector<128x128xf32>
      tpu.vector_store %arg6[%c0_10, %c0_11], %12 {strides = array<i32>} : memref<128x128xf32, #tpu.memory_space<vmem>>, vector<128x128xf32>,
    } else {
    }
    %c0 = arith.constant 0 : index
    %c0_1 = arith.constant 0 : index
    %3 = vector.load %arg6[%c0, %c0_1] : memref<128x128xf32, #tpu.memory_space<vmem>>, vector<128x128xf32>
    %c0_2 = arith.constant 0 : index
    %c0_3 = arith.constant 0 : index
    %4 = vector.load %arg3[%c0_2, %c0_3] : memref<128x128xbf16, #tpu.memory_space<vmem>>, vector<128x128xbf16>
    %c0_4 = arith.constant 0 : index
    %c0_5 = arith.constant 0 : index
    %5 = vector.load %arg4[%c0_4, %c0_5] : memref<128x128xbf16, #tpu.memory_space<vmem>>, vector<128x128xbf16>
    %cst = arith.constant dense<0.000000e+00> : vector<128x128xf32>
    %6 = tpu.matmul %4, %5, %cst {dimension_numbers = #tpu.dot_dimension_numbers<[1], [0], [0], [1], [0, 0, 1, 1], [], []>} : vector<128x128xbf16>, vector<128x128xbf16>, vector<128x128xf32> -> vector<128x128xf32>
    %7 = arith.addf %3, %6 : vector<128x128xf32>
    %c0_6 = arith.constant 0 : index
    %c0_7 = arith.constant 0 : index
    %8 = vector.load %arg6[%c0_6, %c0_7] : memref<128x128xf32, #tpu.memory_space<vmem>>, vector<128x128xf32>
    tpu.vector_store %arg6[%c0_6, %c0_7], %7 {strides = array<i32>} : memref<128x128xf32, #tpu.memory_space<vmem>>, vector<128x128xf32>,
    %c1_i32 = arith.constant 1 : i32
    %9 = arith.cmpi eq, %arg2, %c1_i32 : i32
    %10 = arith.extui %9 : i1 to i32
    %c0_i32_8 = arith.constant 0 : i32
    %11 = arith.cmpi ne, %10, %c0_i32_8 : i32
    scf.if %11 {
      %c0_9 = arith.constant 0 : index
      %c0_10 = arith.constant 0 : index
      %12 = vector.load %arg6[%c0_9, %c0_10] : memref<128x128xf32, #tpu.memory_space<vmem>>, vector<128x128xf32>
      %c0_11 = arith.constant 0 : index
      %c0_12 = arith.constant 0 : index
      %13 = vector.load %arg5[%c0_11, %c0_12] : memref<128x128xf32, #tpu.memory_space<vmem>>, vector<128x128xf32>
      tpu.vector_store %arg5[%c0_11, %c0_12], %12 {strides = array<i32>} : memref<128x128xf32, #tpu.memory_space<vmem>>, vector<128x128xf32>,
    } else {
    }
    return
  }
  func.func @transform_0(%arg0: i32, %arg1: i32, %arg2: i32) -> (i32, i32) {
    %c0_i32 = arith.constant 0 : i32
    return %arg0, %arg2 : i32, i32
  }
  func.func @transform_1(%arg0: i32, %arg1: i32, %arg2: i32) -> (i32, i32) {
    %c0_i32 = arith.constant 0 : i32
    return %arg2, %arg1 : i32, i32
  }
  func.func @transform_2(%arg0: i32, %arg1: i32, %arg2: i32) -> (i32, i32) {
    %c0_i32 = arith.constant 0 : i32
    return %arg0, %arg1 : i32, i32
  }
}

</mosaic_0001>

<bundles_post_ra>
// kernel: tpu_custom_call.1
= control target key start
LH: loop header
LB: loop body
LE: loop exit
PB: predicated region body
PF: predicated region fallthrough
CT: control target
= control target key end

     0   :  { %s1574_s0 = inlined_call_operand.hbm [shape: bf16[512,256], index: 0, kind: input, shape index: {}]   ;;  %s1575_s1 = inlined_call_operand.hbm [shape: bf16[256,128], index: 1, kind: input, shape index: {}]   ;;  %s1576_s2 = inlined_call_operand.hbm [shape: f32[512,128], index: 2, kind: output, shape index: {}]  }
   0x1   :  { %1588 = sst [smem:[#allocation17_spill]] %s1574_s0 }
   0x2   :  { %1589 = sst [smem:[#allocation18_spill]] %s1575_s1 }
   0x3   :  { %1590 = sst [smem:[#allocation19_spill]] %s1576_s2 }
   0x4   :  { %7 = vsyncpa [#allocation4], 0 }
   0x5   :  { %9 = vsyncpa [#allocation4 + $0x1], 0 }
   0x6   :  { %10 = vsyncpa [#allocation7], 0 }
   0x7   :  { %12 = vsyncpa [#allocation7 + $0x1], 0 }
   0x8   :  { %13 = vsyncpa [#allocation5], 0 }
   0x9   :  { %15 = vsyncpa [#allocation5 + $0x1], 0  ;;  %s1188_s9 = smov 0   ;;  %s1190_s10 = smov 0  }
   0xa   :  { %s1192_s11 = smov 0   ;;  %s1194_s12 = smov 0  }
   0xb   :  { %s1196_s13 = smov 0   ;;  %s1198_s14 = smov 0  }
   0xc   :  { %s1200_s15 = smov 0   ;;  %s1202_s16 = smov 0  }
   0xd   :  { %s1204_s17 = smov 0   ;;  %s1206_s18 = smov 0  }
   0xe   :  { %s1208_s19 = smov 0   ;;  %s1210_s20 = smov 0  }
   0xf   :  { %s1212_s21 = smov 0   ;;  %s1214_s22 = smov 0  }
  0x10 LB: > { %1591 = sst [smem:[#allocation12_spill]] %s1110_s9  ;;  %s33_s23 = sadd.s32 1, %s1154_s20  ;;  %s1162_s22 = sphi %s1214_s22, %s21_s22   ;;  %s1158_s21 = sphi %s1212_s21, %s1637_s21   ;;  %s1154_s20 = sphi %s1210_s20, %s1636_s20   ;;  %s1150_s19 = sphi %s1208_s19, %s1635_s19   ;;  %s1146_s18 = sphi %s1206_s18, %s1634_s18   ;;  %s1142_s17 = sphi %s1204_s17, %s1633_s17   ;;  %s1138_s16 = sphi %s1202_s16, %s1632_s16   ;;  %s1134_s15 = sphi %s1200_s15, %s1631_s15   ;;  %s1130_s14 = sphi %s1198_s14, %s1630_s14   ;;  %s1126_s13 = sphi %s1196_s13, %s1629_s13   ;;  %s1122_s12 = sphi %s1194_s12, %s1628_s12   ;;  %s1118_s11 = sphi %s1192_s11, %s1627_s11   ;;  %s1114_s10 = sphi %s1190_s10, %s1626_s10   ;;  %s1110_s9 = sphi %s1188_s9, %s1625_s9  }
  0x11   : > { %1592 = sst [smem:[#allocation13_spill]] %s1146_s18  ;;  %s40_s24 = sadd.s32 1, %s1158_s21 }
  0x12   : > { %1593 = sst [smem:[#allocation14_spill]] %s1150_s19  ;;  %p34_p0 = scmp.ge.s32.totalorder %s33_s23, 2 }
  0x13   : > { %s49_s25 = sadd.s32 1, %s1142_s17  ;;  %p56_p1 = scmp.ne.s32.totalorder %s1142_s17, %s1138_s16 }
  0x14   : > { %p1581_p2 = scmp.eq.s32.totalorder %s1162_s22, 0  ;;  %s1639_s23 = smov (%p34_p0, %s33_s23), 0 }
  0x15   : > { %1594 = sst [smem:[#allocation15_spill]] %s1639_s23  ;;  %s1641_s24 = smov (!%p34_p0, %s40_s24), %s1158_s21 }
  0x16   : > { %s1269_s26 = ssub.s32 %s1154_s20, %s1639_s23  ;;  %p1273_p3 = por %p1581_p2, %p56_p1 }
  0x17   : > { %p42_p4 = scmp.ge.s32.totalorder %s1641_s24, 4  ;;  %s105_s28 = sadd.s32 1, %s1118_s11 }
  0x18   : > { %p1580_p7 = scmp.lt.s32.totalorder %s1162_s22, 8  ;;  %s142_s30 = sand.u32 1, %s1142_s17  }
  0x19   : > { %s1643_s24 = smov (%p42_p4, %s1641_s24), 0  ;;  %s698_s6 = sshll.u32 %s142_s30, 6 }
  0x1a   : > { %1596 = sst [smem:[#allocation16_spill]] %s1643_s24  ;;  %s44_s29 = ssub.s32 %s1158_s21, %s1643_s24 }
  0x1b   : > { %s46_s3 = sor.u32 %s1269_s26, %s44_s29  ;;  %p103_p8 = scmp.eq.s32.totalorder %s44_s29, 0 }
  0x1c   : > { %p47_p9 = scmp.eq.s32.totalorder %s46_s3, 0  ;;  %s732_s7 = sshll.u32 %s1158_s21, 5 }
  0x1d   : > { %s1289_s4 = scalar_select %p103_p8, %s1118_s11, %s105_s28  }
  0x1e   : > { %s1292_s5 = scalar_select %p47_p9, %s1142_s17, %s49_s25  }
  0x1f   : > { %s152_s8 = sadd.s32 %s1154_s20, %s732_s7  ;;  %s146_s2 = scalar_lea.vmem [#allocation3], %s698_s6 }
  0x20   : > { %s701_s23 = sshll.u32 %s152_s8, 6  ;;  %s155_s19 = sshll.u32 %s146_s2, 4  ;;  %s1301_s19 = int_to_ptr.vmem [resolvable:$true] %s155_s19 }
  0x21   : > { %s1597_s0 = sld [smem:[#allocation17_spill]]  ;;  %p1307_p10 = pnand %p1580_p7, %p1273_p3 }
  0x22   : > { %p705_p11 = scmp.ge.s32.totalorder %s1162_s22, 1  ;;  %s1312_s2 = scalar_lea.sflag [#allocation4], %s142_s30 }
  0x23   : > { %p954_p13 = pneg %p1307_p10 }
  0x27   : > { %s1299_s9 = scalar_lea.hbm %s1597_s0, %s701_s23  ;;  %s957_s27 = scalar_lea.hbm %s1597_s0, 8192 }
  0x28   : > { %s952_s1 = scalar_lea.hbm %s1299_s9, 1024  ;;  %p958_p3 = scmp.lt.u32.totalorder %s1299_s9, %s1597_s0 }
  0x29   : > { %p953_p12 = scmp.ne.s32.totalorder %s1299_s9, %s952_s1  ;;  %p959_p4 = scmp.lt.u32.totalorder %s957_s27, %s952_s1 }
  0x2a   : > { %p961_p9 = scmp.lt.u32.totalorder %s952_s1, %s1299_s9 }
  0x2b   : > { %p955_p0 = pnand %p954_p13, %p953_p12  ;;  %p960_p8 = por %p959_p4, %p958_p3 }
  0x2d   : > { %p956_p1 = pneg %p955_p0  ;;  %p962_p7 = por %p961_p9, %p960_p8 }
  0x2f   : > { %p963_p2 = pnand %p962_p7, %p956_p1 }
  0x31   : > { %966 = shalt.err (!%p963_p2)
}
  0x32   : > { %s967_s30 = scalar_lea.vmem %s1301_s19, 1024  ;;  %s1164_s3 = smov [#allocation3]  }
  0x33   : > { %p968_p12 = scmp.ne.s32.totalorder %s1301_s19, %s967_s30  ;;  %s972_s6 = sshll.u32 %s1164_s3, 4  ;;  %s973_s6 = int_to_ptr.vmem [resolvable:$false] %s972_s6 }
  0x34   : > { %s974_s7 = scalar_lea.vmem %s973_s6, 2048  ;;  %p975_p6 = scmp.lt.s32.totalorder %s1301_s19, %s973_s6 }
  0x35   : > { %p970_p0 = pnand %p968_p12, %p954_p13  ;;  %p976_p3 = scmp.lt.s32.totalorder %s974_s7, %s967_s30 }
  0x37   : > { %p971_p5 = pneg %p970_p0  ;;  %p977_p4 = por %p976_p3, %p975_p6 }
  0x39   : > { %p978_p8 = pnand %p977_p4, %p971_p5 }
  0x3b   : > { %981 = shalt.err (!%p978_p8)
}
  0x3c   : > { %s1165_s8 = smov 128   ;;  %s1582_s1 = smov 64  }
  0x3d   : > { %s1583_s18 = smov 4   ;;  %s1599_s23 = sld [smem:[#allocation12_spill]] }
  0x3e   : > { %808 = dma.hbm_to_vmem [thread:$0]  (!%p1307_p10), %s1299_s9, 1024, %s1301_s19, %s1312_s2, %s1165_s8, %s1582_s1, %s1583_s18  }
  0x3f   : > { %p185_p2 = scmp.lt.s32.totalorder %s1162_s22, 9  ;;  %s694_s28 = sadd.s32 4294967295, %s1162_s22  }
  0x40   : > { %s695_s29 = sadd.s32 4294967294, %s1162_s22   ;;  %p63_p6 = scmp.eq.s32.totalorder %s694_s28, 0 }
  0x41   : > { %p1345_p5 = pnand %p705_p11, %p185_p2  ;;  %s77_s30 = sadd.s32 1, %s1130_s14 }
  0x42   : > { %p1601_p7 = scmp.eq.s32.totalorder %s1269_s26, 0  ;;  %p1602_p13 = scmp.ne.s32.totalorder %s1138_s16, %s1134_s15 }
  0x43   : > { %p84_p10 = scmp.ne.s32.totalorder %s1130_s14, %s1126_s13  ;;  %p90_p11 = scmp.ne.s32.totalorder %s1126_s13, %s1122_s12 }
  0x44   : > { %s1355_s3 = scalar_select %p1601_p7, %s1130_s14, %s77_s30  }
  0x45   : > { %p1360_p1 = por %p63_p6, %p1602_p13  ;;  %p115_p9 = scmp.ne.s32.totalorder %s1118_s11, %s1114_s10 }
  0x46   : > { %p1604_p12 = scmp.eq.s32.totalorder %s1162_s22, 0  ;;  %p116_p3 = scmp.eq.s32.totalorder %s694_s28, 7 }
  0x47   : > { %s1603_s25 = scalar_select %p1360_p1, 1, 0 }
  0x48   : > { %p86_p0 = por %p84_p10, %p1604_p12  ;;  %p1372_p4 = por %p90_p11, %p63_p6 }
  0x49   : > { %p121_p8 = scmp.ne.s32.totalorder %s1114_s10, %s1599_s23  ;;  %p1378_p2 = por %p116_p3, %p115_p9 }
  0x4a   : > { %s1605_s9 = scalar_select %p1372_p4, 1, 0 }
  0x4b   : > { %s1606_s19 = scalar_select %p1378_p2, 1, 0 }
  0x4c   : > { %p122_p7 = scmp.eq.s32.totalorder %s695_s29, 7  ;;  %s165_s15 = sand.u32 1, %s1130_s14  }
  0x4d   : > { %s733_s26 = sshll.u32 %s1154_s20, 10  ;;  %s702_s12 = sshll.u32 %s165_s15, 6 }
  0x4e   : > { %p1384_p13 = por %p122_p7, %p121_p8  ;;  %s1608_s8 = sld [smem:[#allocation18_spill]] }
  0x4f   : > { %p1609_p6 = scmp.lt.s32.totalorder %s1162_s22, 8  ;;  %s169_s29 = scalar_lea.vmem [#allocation6], %s702_s12 }
  0x50   : > { %s1607_s2 = scalar_select %p1384_p13, 1, 0 }
  0x51   : > { %p1395_p10 = pnand %p1609_p6, %p86_p0  ;;  %s177_s30 = sshll.u32 %s169_s29, 4  ;;  %s1399_s30 = int_to_ptr.vmem [resolvable:$true] %s177_s30 }
  0x52   : > { %s1401_s1 = scalar_lea.sflag [#allocation7], %s165_s15 }
  0x53   : > { %p984_p9 = pneg %p1395_p10 }
  0x54   : > { %s1391_s28 = scalar_lea.hbm %s1608_s8, %s733_s26  ;;  %s987_s18 = scalar_lea.hbm %s1608_s8, 2048 }
  0x55   : > { %s982_s6 = scalar_lea.hbm %s1391_s28, 1024  ;;  %p988_p0 = scmp.lt.u32.totalorder %s1391_s28, %s1608_s8 }
  0x56   : > { %p983_p11 = scmp.ne.s32.totalorder %s1391_s28, %s982_s6  ;;  %p989_p8 = scmp.lt.u32.totalorder %s987_s18, %s982_s6 }
  0x57   : > { %p991_p6 = scmp.lt.u32.totalorder %s982_s6, %s1391_s28 }
  0x58   : > { %p985_p12 = pnand %p984_p9, %p983_p11  ;;  %p990_p7 = por %p989_p8, %p988_p0 }
  0x5a   : > { %p986_p3 = pneg %p985_p12  ;;  %p992_p13 = por %p991_p6, %p990_p7 }
  0x5c   : > { %p993_p2 = pnand %p992_p13, %p986_p3 }
  0x5e   : > { %996 = shalt.err (!%p993_p2)
}
  0x5f   : > { %s997_s15 = scalar_lea.vmem %s1399_s30, 1024  ;;  %s1168_s12 = smov [#allocation6]  }
  0x60   : > { %p998_p11 = scmp.ne.s32.totalorder %s1399_s30, %s997_s15  ;;  %s1002_s29 = sshll.u32 %s1168_s12, 4  ;;  %s1003_s29 = int_to_ptr.vmem [resolvable:$false] %s1002_s29 }
  0x61   : > { %s1004_s0 = scalar_lea.vmem %s1003_s29, 2048  ;;  %p1005_p1 = scmp.lt.s32.totalorder %s1399_s30, %s1003_s29 }
  0x62   : > { %p1000_p12 = pnand %p998_p11, %p984_p9  ;;  %p1006_p0 = scmp.lt.s32.totalorder %s1004_s0, %s997_s15 }
  0x64   : > { %p1001_p4 = pneg %p1000_p12  ;;  %p1007_p8 = por %p1006_p0, %p1005_p1 }
  0x66   : > { %p1008_p7 = pnand %p1007_p8, %p1001_p4 }
  0x68   : > { %1011 = shalt.err (!%p1008_p7)
}
  0x69   : > { %s1611_s24 = smov 4   ;;  %s1612_s18 = smov 64  }
  0x6a   : > { %811 = dma.hbm_to_vmem [thread:$0]  (!%p1395_p10), %s1391_s28, 1024, %s1399_s30, %s1401_s1, %s1612_s18, %s1612_s18, %s1611_s24  }
  0x6b   : > { %189 = sbr.rel (%p1345_p5) target bundleno = 431 (0x1af), region = 28  ;;  %s191_s6 = sand.u32 (!%p1345_p5), 1, %s1138_s16  }
  0x6c   : > { %s706_s26 = sshll.u32 (!%p1345_p5), %s191_s6, 6  ;;  %s192_s7 = scalar_lea.sflag (!%p1345_p5), [#allocation4], %s191_s6 }
  0x6d   : > { %s1435_s15 = scalar_lea.vmem (!%p1345_p5), [#allocation3], %s706_s26  ;;  %p1613_p1 = scmp.ne.s32.totalorder (!%p1345_p5), %s1603_s25, 0 }
  0x72   : > { %1097 = dma.done.wait (%p1613_p1), %s192_s7, 1024  }
  0x73   : > { %1099 = vsyncadd (%p1613_p1), %s192_s7, 4294966272  ;;  %s200_s23 = sand.u32 1, %s1126_s13   ;;  %p1614_p5 = scmp.ne.s32.totalorder %s1605_s9, 0 }
  0x74   : > { %s707_s12 = sshll.u32 %s200_s23, 6  ;;  %s201_s1 = scalar_lea.sflag [#allocation7], %s200_s23 }
  0x75   : > { %s1442_s28 = scalar_lea.vmem [#allocation6], %s707_s12 }
  0x76   : > { %1101 = dma.done.wait (%p1614_p5), %s201_s1, 1024  }
  0x77   : > { %1103 = vsyncadd (%p1614_p5), %s201_s1, 4294966272  ;;  %s227_s27 = sand.u32 1, %s1114_s10   ;;  %s1615_s25 = sld [smem:[#allocation13_spill]] }
  0x78   : > { %s708_s30 = sshll.u32 %s227_s27, 7 }
  0x79   : > { %s1451_s29 = scalar_lea.vmem [#allocation8], %s708_s30 }
  0x7d   : > { %p709_p4 = scmp.ne.s32.totalorder %s1615_s25, 0 }
  0x7e   : > { %v1169_v0 = vmov (!%p709_p4), 0.0  }
  0x7f   : > { %237 = sbr.rel (%p709_p4) target bundleno = 135 (0x87), region = 40  ;;  %238 = vst [vmem:[#allocation2] sm:$0xff] (!%p709_p4), %v1169_v0  ;;  %239 = vst [vmem:[#allocation2 + $0x8] sm:$0xff] (!%p709_p4), %v1169_v0 }
  0x80   : > { %240 = vst [vmem:[#allocation2 + $0x10] sm:$0xff] (!%p709_p4), %v1169_v0  ;;  %241 = vst [vmem:[#allocation2 + $0x18] sm:$0xff] (!%p709_p4), %v1169_v0 }
  0x81   : > { %242 = vst [vmem:[#allocation2 + $0x20] sm:$0xff] (!%p709_p4), %v1169_v0  ;;  %243 = vst [vmem:[#allocation2 + $0x28] sm:$0xff] (!%p709_p4), %v1169_v0 }
  0x82   : > { %244 = vst [vmem:[#allocation2 + $0x30] sm:$0xff] (!%p709_p4), %v1169_v0  ;;  %245 = vst [vmem:[#allocation2 + $0x38] sm:$0xff] (!%p709_p4), %v1169_v0 }
  0x83   : > { %246 = vst [vmem:[#allocation2 + $0x40] sm:$0xff] (!%p709_p4), %v1169_v0  ;;  %247 = vst [vmem:[#allocation2 + $0x48] sm:$0xff] (!%p709_p4), %v1169_v0 }
  0x84   : > { %248 = vst [vmem:[#allocation2 + $0x50] sm:$0xff] (!%p709_p4), %v1169_v0  ;;  %249 = vst [vmem:[#allocation2 + $0x58] sm:$0xff] (!%p709_p4), %v1169_v0 }
  0x85   : > { %250 = vst [vmem:[#allocation2 + $0x60] sm:$0xff] (!%p709_p4), %v1169_v0  ;;  %251 = vst [vmem:[#allocation2 + $0x68] sm:$0xff] (!%p709_p4), %v1169_v0 }
  0x86   : > { %252 = vst [vmem:[#allocation2 + $0x70] sm:$0xff] %v1169_v0  ;;  %253 = vst [vmem:[#allocation2 + $0x78] sm:$0xff] %v1169_v0 }
  0x87 PF: > { %v936_v1 = vld [vmem:[%s1442_s28] sm:$0xff]   ;;  %v937_v2 = vld [vmem:[%s1442_s28 + $0x8] sm:$0xff]   ;;  %v938_v3 = vld [vmem:[%s1442_s28 + $0x10] sm:$0xff]   ;;  %s1616_s9 = sld [smem:[#allocation13_spill]] }
  0x88   : > { %751 = vmatprep.subr.bf16.mxu0 %v936_v1  ;;  %783 = vmatprep.subr.bf16.mxu1 %v936_v1  ;;  %v939_v4 = vld [vmem:[%s1442_s28 + $0x18] sm:$0xff]   ;;  %v944_v5 = vld [vmem:[%s1435_s15] sm:$0xff]   ;;  %v941_v8 = vld [vmem:[%s1442_s28 + $0x28] sm:$0xff]  }
  0x89   : > { %752 = vmatpush3.bf16.msra.mxu0 %v936_v1  ;;  %791 = vmatpush3.bf16.msra.mxu1 %v936_v1  ;;  %v945_v6 = vld [vmem:[%s1435_s15 + $0x20] sm:$0xff]   ;;  %v942_v9 = vld [vmem:[%s1442_s28 + $0x30] sm:$0xff]   ;;  %v943_v10 = vld [vmem:[%s1442_s28 + $0x38] sm:$0xff]  }
  0x8a   : > { %753 = vmatprep.subr.bf16.mxu0 %v937_v2  ;;  %784 = vmatprep.subr.bf16.mxu1 %v937_v2  ;;  %v940_v7 = vld [vmem:[%s1442_s28 + $0x20] sm:$0xff]   ;;  %v946_v11 = vld [vmem:[%s1435_s15 + $0x8] sm:$0xff]   ;;  %v948_v13 = vld [vmem:[%s1435_s15 + $0x10] sm:$0xff]  }
  0x8b   : > { %767 = vmatprep.mubr.bf16.mxu0 %v944_v5  ;;  %775 = vmatprep.mubr.bf16.mxu1 %v945_v6  ;;  %v947_v12 = vld [vmem:[%s1435_s15 + $0x28] sm:$0xff]   ;;  %v949_v14 = vld [vmem:[%s1435_s15 + $0x30] sm:$0xff]   ;;  %v950_v15 = vld [vmem:[%s1435_s15 + $0x18] sm:$0xff]  }
  0x8c   : > { %v951_v16 = vld [vmem:[%s1435_s15 + $0x38] sm:$0xff]   ;;  %v256_v17 = vld [vmem:[#allocation2 + $0x10] sm:$0xff]  ;;  %v254_v19 = vld [vmem:[#allocation2] sm:$0xff] }
  0x8d   : > { %754 = vmatpush3.bf16.msra.mxu0 %v937_v2  ;;  %792 = vmatpush3.bf16.msra.mxu1 %v937_v2  ;;  %v264_v18 = vld [vmem:[#allocation2 + $0x50] sm:$0xff]  ;;  %v262_v20 = vld [vmem:[#allocation2 + $0x40] sm:$0xff]  ;;  %v257_v23 = vld [vmem:[#allocation2 + $0x18] sm:$0xff]  ;;  %p726_p2 = scmp.ne.s32.totalorder %s1616_s9, 1 }
  0x8e   : > { %755 = vmatprep.subr.bf16.mxu0 %v938_v3  ;;  %785 = vmatprep.subr.bf16.mxu1 %v938_v3  ;;  %v265_v24 = vld [vmem:[#allocation2 + $0x58] sm:$0xff]  ;;  %v255_v29 = vld [vmem:[#allocation2 + $0x8] sm:$0xff]  ;;  %v260_v41 = vld [vmem:[#allocation2 + $0x30] sm:$0xff] }
  0x8f   : > { %v263_v30 = vld [vmem:[#allocation2 + $0x48] sm:$0xff]  ;;  %v268_v42 = vld [vmem:[#allocation2 + $0x70] sm:$0xff]  ;;  %v258_v43 = vld [vmem:[#allocation2 + $0x20] sm:$0xff] }
  0x90   : > { %v266_v44 = vld [vmem:[#allocation2 + $0x60] sm:$0xff]  ;;  %v261_v47 = vld [vmem:[#allocation2 + $0x38] sm:$0xff]  ;;  %v259_v53 = vld [vmem:[#allocation2 + $0x28] sm:$0xff] }
  0x91   : > { %756 = vmatpush3.bf16.msra.mxu0 %v938_v3  ;;  %793 = vmatpush3.bf16.msra.mxu1 %v938_v3  ;;  %v269_v48 = vld [vmem:[#allocation2 + $0x78] sm:$0xff]  ;;  %v267_v54 = vld [vmem:[#allocation2 + $0x68] sm:$0xff] }
  0x92   : > { %757 = vmatprep.subr.bf16.mxu0 %v939_v4  ;;  %786 = vmatprep.subr.bf16.mxu1 %v939_v4 }
  0x95   : > { %758 = vmatpush3.bf16.msra.mxu0 %v939_v4  ;;  %794 = vmatpush3.bf16.msra.mxu1 %v939_v4 }
  0x96   : > { %759 = vmatprep.subr.bf16.mxu0 %v940_v7  ;;  %787 = vmatprep.subr.bf16.mxu1 %v940_v7 }
  0x99   : > { %760 = vmatpush3.bf16.msra.mxu0 %v940_v7  ;;  %795 = vmatpush3.bf16.msra.mxu1 %v940_v7 }
  0x9a   : > { %761 = vmatprep.subr.bf16.mxu0 %v941_v8  ;;  %788 = vmatprep.subr.bf16.mxu1 %v941_v8 }
  0x9d   : > { %762 = vmatpush3.bf16.msra.mxu0 %v941_v8  ;;  %796 = vmatpush3.bf16.msra.mxu1 %v941_v8 }
  0x9e   : > { %763 = vmatprep.subr.bf16.mxu0 %v942_v9  ;;  %789 = vmatprep.subr.bf16.mxu1 %v942_v9 }
  0xa1   : > { %764 = vmatpush3.bf16.msra.mxu0 %v942_v9  ;;  %797 = vmatpush3.bf16.msra.mxu1 %v942_v9 }
  0xa2   : > { %765 = vmatprep.subr.bf16.mxu0 %v943_v10  ;;  %790 = vmatprep.subr.bf16.mxu1 %v943_v10 }
  0xa5   : > { %766 = vmatpush3.bf16.msra.mxu0 %v943_v10  ;;  %798 = vmatpush3.bf16.msra.mxu1 %v943_v10 }
  0xa8   : > { %768 = vmatmul.mubr.bf16.vlgmr.msra.gmra.mrb[0].mxu0 %v946_v11  ;;  %776 = vmatmul.mubr.bf16.vlgmr.msra.gmra.mrb[0].mxu1 %v947_v12 }
  0xa9   : > { %771 = vmatprep.mubr.bf16.mxu0 %v948_v13  ;;  %779 = vmatprep.mubr.bf16.mxu1 %v949_v14 }
  0xb0   : > { %772 = vmatmul.mubr.bf16.gmra.mrb[4].mxu0 %v950_v15  ;;  %780 = vmatmul.mubr.bf16.gmra.mrb[4].mxu1 %v951_v16 }
 0x17b   : > { %v769_v21 = vpop.f32.mrb[0].mxu0  ;;  %v777_v22 = vpop.f32.mrb[0].mxu1 }
 0x17c   : > { %v497_v25 = vadd.f32 %v769_v21, %v256_v17  ;;  %v505_v26 = vadd.f32 %v777_v22, %v264_v18  ;;  %v432_v27 = vpop.f32.mrb[1].mxu0  ;;  %v464_v28 = vpop.f32.mrb[1].mxu1 }
 0x17d   : > { %v495_v31 = vadd.f32 %v432_v27, %v254_v19  ;;  %v503_v32 = vadd.f32 %v464_v28, %v262_v20  ;;  %v770_v33 = vpop.f32.mrb[2].mxu0  ;;  %v778_v34 = vpop.f32.mrb[2].mxu1 }
 0x17e   : > { %513 = vst [vmem:[#allocation2 + $0x10] sm:$0xff] %v497_v25  ;;  %521 = vst [vmem:[#allocation2 + $0x50] sm:$0xff] %v505_v26  ;;  %v498_v35 = vadd.f32 %v770_v33, %v257_v23  ;;  %v506_v36 = vadd.f32 %v778_v34, %v265_v24  ;;  %v435_v37 = vpop.f32.mrb[3].mxu0  ;;  %v467_v38 = vpop.f32.mrb[3].mxu1 }
 0x17f   : > { %511 = vst [vmem:[#allocation2] sm:$0xff] %v495_v31  ;;  %519 = vst [vmem:[#allocation2 + $0x40] sm:$0xff] %v503_v32  ;;  %v496_v39 = vadd.f32 %v435_v37, %v255_v29  ;;  %v504_v40 = vadd.f32 %v467_v38, %v263_v30 }
 0x180   : > { %514 = vst [vmem:[#allocation2 + $0x18] sm:$0xff] %v498_v35  ;;  %522 = vst [vmem:[#allocation2 + $0x58] sm:$0xff] %v506_v36 }
 0x181   : > { %512 = vst [vmem:[#allocation2 + $0x8] sm:$0xff] %v496_v39  ;;  %520 = vst [vmem:[#allocation2 + $0x48] sm:$0xff] %v504_v40 }
 0x183   : > { %v773_v45 = vpop.f32.mrb[4].mxu0  ;;  %v781_v46 = vpop.f32.mrb[4].mxu1  ;;  %530 = sbr.rel (%p726_p2) target bundleno = 403 (0x193), region = 44 }
 0x184   : > { %v501_v49 = vadd.f32 %v773_v45, %v260_v41  ;;  %v509_v50 = vadd.f32 %v781_v46, %v268_v42  ;;  %v448_v51 = vpop.f32.mrb[5].mxu0  ;;  %v480_v52 = vpop.f32.mrb[5].mxu1 }
 0x185   : > { %v499_v55 = vadd.f32 %v448_v51, %v258_v43  ;;  %v507_v56 = vadd.f32 %v480_v52, %v266_v44  ;;  %v774_v57 = vpop.f32.mrb[6].mxu0  ;;  %v782_v58 = vpop.f32.mrb[6].mxu1  ;;  %v533_v3 = vld [vmem:[#allocation2 + $0x10] sm:$0xff] (!%p726_p2) }
 0x186   : > { %517 = vst [vmem:[#allocation2 + $0x30] sm:$0xff] %v501_v49  ;;  %525 = vst [vmem:[#allocation2 + $0x70] sm:$0xff] %v509_v50  ;;  %v502_v59 = vadd.f32 %v774_v57, %v261_v47  ;;  %v510_v60 = vadd.f32 %v782_v58, %v269_v48  ;;  %v451_v61 = vpop.f32.mrb[7].mxu0  ;;  %v483_v62 = vpop.f32.mrb[7].mxu1  ;;  %v531_v1 = vld [vmem:[#allocation2] sm:$0xff] (!%p726_p2)  ;;  %v541_v11 = vld [vmem:[#allocation2 + $0x50] sm:$0xff] (!%p726_p2) }
 0x187   : > { %515 = vst [vmem:[#allocation2 + $0x20] sm:$0xff] %v499_v55  ;;  %523 = vst [vmem:[#allocation2 + $0x60] sm:$0xff] %v507_v56  ;;  %v500_v63 = vadd.f32 %v451_v61, %v259_v53  ;;  %v508_v0 = vadd.f32 %v483_v62, %v267_v54  ;;  %v534_v4 = vld [vmem:[#allocation2 + $0x18] sm:$0xff] (!%p726_p2)  ;;  %v539_v9 = vld [vmem:[#allocation2 + $0x40] sm:$0xff] (!%p726_p2) }
 0x188   : > { %518 = vst [vmem:[#allocation2 + $0x38] sm:$0xff] %v502_v59  ;;  %526 = vst [vmem:[#allocation2 + $0x78] sm:$0xff] %v510_v60  ;;  %v532_v2 = vld [vmem:[#allocation2 + $0x8] sm:$0xff] (!%p726_p2)  ;;  %v542_v12 = vld [vmem:[#allocation2 + $0x58] sm:$0xff] (!%p726_p2) }
 0x189   : > { %516 = vst [vmem:[#allocation2 + $0x28] sm:$0xff] %v500_v63  ;;  %524 = vst [vmem:[#allocation2 + $0x68] sm:$0xff] %v508_v0  ;;  %v540_v10 = vld [vmem:[#allocation2 + $0x48] sm:$0xff] (!%p726_p2) }
 0x18a   : > { %547 = vst [vmem:[%s1451_s29] sm:$0xff] %v531_v1  ;;  %548 = vst [vmem:[%s1451_s29 + $0x8] sm:$0xff] %v532_v2 }
 0x18b   : > { %549 = vst [vmem:[%s1451_s29 + $0x10] sm:$0xff] %v533_v3  ;;  %550 = vst [vmem:[%s1451_s29 + $0x18] sm:$0xff] %v534_v4 }
 0x18c   : > { %555 = vst [vmem:[%s1451_s29 + $0x40] sm:$0xff] %v539_v9  ;;  %556 = vst [vmem:[%s1451_s29 + $0x48] sm:$0xff] %v540_v10 }
 0x18d   : > { %v537_v7 = vld [vmem:[#allocation2 + $0x30] sm:$0xff]  ;;  %557 = vst [vmem:[%s1451_s29 + $0x50] sm:$0xff] %v541_v11  ;;  %558 = vst [vmem:[%s1451_s29 + $0x58] sm:$0xff] %v542_v12 }
 0x18e   : > { %v535_v5 = vld [vmem:[#allocation2 + $0x20] sm:$0xff]  ;;  %553 = vst [vmem:[%s1451_s29 + $0x30] sm:$0xff] %v537_v7  ;;  %v545_v15 = vld [vmem:[#allocation2 + $0x70] sm:$0xff] }
 0x18f   : > { %551 = vst [vmem:[%s1451_s29 + $0x20] sm:$0xff] %v535_v5  ;;  %v538_v8 = vld [vmem:[#allocation2 + $0x38] sm:$0xff]  ;;  %v543_v13 = vld [vmem:[#allocation2 + $0x60] sm:$0xff]  ;;  %561 = vst [vmem:[%s1451_s29 + $0x70] sm:$0xff] %v545_v15 }
 0x190   : > { %v536_v6 = vld [vmem:[#allocation2 + $0x28] sm:$0xff]  ;;  %554 = vst [vmem:[%s1451_s29 + $0x38] sm:$0xff] %v538_v8  ;;  %559 = vst [vmem:[%s1451_s29 + $0x60] sm:$0xff] %v543_v13  ;;  %v546_v16 = vld [vmem:[#allocation2 + $0x78] sm:$0xff] }
 0x191   : > { %552 = vst [vmem:[%s1451_s29 + $0x28] sm:$0xff] %v536_v6  ;;  %v544_v14 = vld [vmem:[#allocation2 + $0x68] sm:$0xff]  ;;  %562 = vst [vmem:[%s1451_s29 + $0x78] sm:$0xff] %v546_v16 }
 0x192   : > { %560 = vst [vmem:[%s1451_s29 + $0x68] sm:$0xff] %v544_v14 }
 0x193 PF: > { %s1617_s0 = sld [smem:[#allocation14_spill]]  ;;  %s1618_s26 = sld [smem:[#allocation19_spill]] }
 0x194   : > { %s578_s15 = sshll.u32 %s1451_s29, 4  ;;  %s1498_s23 = scalar_lea.sflag [#allocation5], %s227_s27  ;;  %s1494_s15 = int_to_ptr.vmem [resolvable:$true] %s578_s15 }
 0x195   : > { %s1012_s12 = scalar_lea.vmem %s1494_s15, 2048  ;;  %p1619_p10 = scmp.ne.s32.totalorder %s1606_s19, 0 }
 0x196   : > { %p1013_p13 = scmp.ne.s32.totalorder %s1494_s15, %s1012_s12  ;;  %s1170_s1 = smov [#allocation8]  }
 0x197   : > { %s1016_s28 = sshll.u32 %s1170_s1, 4  ;;  %s1017_s28 = int_to_ptr.vmem [resolvable:$false] %s1016_s28 }
 0x198   : > { %p1014_p9 = pnand %p1013_p13, %p1619_p10  ;;  %s1018_s30 = scalar_lea.vmem %s1017_s28, 4096 }
 0x199   : > { %s734_s24 = sshll.u32 %s1617_s0, 11  ;;  %p1019_p6 = scmp.lt.s32.totalorder %s1494_s15, %s1017_s28 }
 0x19a   : > { %s1491_s7 = scalar_lea.hbm %s1618_s26, %s734_s24  ;;  %p1015_p3 = pneg %p1014_p9 }
 0x19b   : > { %p1020_p11 = scmp.lt.s32.totalorder %s1018_s30, %s1012_s12 }
 0x19d   : > { %p1021_p12 = por %p1020_p11, %p1019_p6 }
 0x19f   : > { %p1022_p0 = pnand %p1021_p12, %p1015_p3 }
 0x1a1   : > { %1025 = shalt.err (!%p1022_p0)
}
 0x1a2   : > { %s1026_s27 = scalar_lea.hbm %s1491_s7, 2048  ;;  %s1030_s9 = scalar_lea.hbm %s1618_s26, 8192 }
 0x1a3   : > { %p1027_p8 = scmp.ne.s32.totalorder %s1491_s7, %s1026_s27  ;;  %p1031_p5 = scmp.lt.u32.totalorder %s1491_s7, %s1618_s26 }
 0x1a4   : > { %p1032_p4 = scmp.lt.u32.totalorder %s1030_s9, %s1026_s27  ;;  %p1034_p13 = scmp.lt.u32.totalorder %s1026_s27, %s1491_s7 }
 0x1a5   : > { %p1028_p7 = pnand %p1027_p8, %p1619_p10 }
 0x1a6   : > { %p1033_p2 = por %p1032_p4, %p1031_p5 }
 0x1a7   : > { %p1029_p1 = pneg %p1028_p7 }
 0x1a8   : > { %p1035_p9 = por %p1034_p13, %p1033_p2 }
 0x1aa   : > { %p1036_p3 = pnand %p1035_p9, %p1029_p1 }
 0x1ac   : > { %1039 = shalt.err (!%p1036_p3)
}
 0x1ad   : > { %s1171_s18 = smov 128   ;;  %s1172_s6 = smov 8  }
 0x1ae   : > { %803 = dma.vmem_to_hbm [thread:$0]  (%p1619_p10), %s1494_s15, 2048, %s1491_s7, %s1498_s23, %s1171_s18, %s1171_s18, %s1172_s6  }
 0x1af PF: > { %s1620_s12 = sld [smem:[#allocation12_spill]]  ;;  %p817_p6 = scmp.ge.s32.totalorder %s1162_s22, 2 }
 0x1b0   : > { %p1621_p11 = scmp.ne.s32.totalorder %s1607_s2, 0 }
 0x1b2   : > { %p813_p12 = pnand %p817_p6, %p1621_p11 }
 0x1b5   : > { %s593_s1 = sand.u32 1, %s1620_s12  }
 0x1b6   : > { %s594_s28 = scalar_lea.sflag [#allocation5], %s593_s1 }
 0x1b7   : > { %1105 = dma.done.wait (!%p813_p12), %s594_s28, 2048  }
 0x1b8   : > { %1107 = vsyncadd (!%p813_p12), %s594_s28, 4294965248  ;;  %s21_s22 = sadd.s32 1, %s1162_s22   ;;  %s1623_s2 = sld [smem:[#allocation15_spill]] }
 0x1b9   : > { %p1527_p0 = scmp.ge.s32.totalorder %s21_s22, 10   ;;  %s1624_s7 = sld [smem:[#allocation16_spill]] }
 0x1ba   : > { %s1625_s9 = smov %s1114_s10  ;;  %s1626_s10 = smov %s1118_s11 }
 0x1bb   : > { %s1627_s11 = smov %s1289_s4  ;;  %s1628_s12 = smov %s1126_s13 }
 0x1bc   : > { %s1629_s13 = smov %s1130_s14  ;;  %s1630_s14 = smov %s1355_s3 }
 0x1bd   : > { %s1631_s15 = smov %s1138_s16  ;;  %s1632_s16 = smov %s1142_s17 }
 0x1be   : > { %s1633_s17 = smov %s1292_s5  ;;  %s1634_s18 = smov %s1154_s20 }
 0x1bf   : > { %s1635_s19 = smov %s1158_s21  ;;  %s1636_s20 = smov %s1623_s2 }
 0x1c0   : > { %s1637_s21 = smov %s1624_s7  ;;  %20 = sbr.rel (!%p1527_p0) target bundleno = 16 (0x10), region = 94 }
 0x1c7   :  { %599 = vsyncpa [#allocation4], 1 }
 0x1c8   :  { %601 = vsyncpa [#allocation4 + $0x1], 1 }
 0x1c9   :  { %602 = vsyncpa [#allocation7], 1 }
 0x1ca   :  { %604 = vsyncpa [#allocation7 + $0x1], 1 }
 0x1cb   :  { %605 = vsyncpa [#allocation5], 1 }
 0x1cc   :  { %607 = vsyncpa [#allocation5 + $0x1], 1 }

</bundles_post_ra>
